<compile_context>
chip_gen: v7x
topology: tpu7x:2x2x1
jax: 0.10.0
libtpu: 0.0.40
codegen_flags: <defaults>
</compile_context>

<pallas_src>
import functools

import jax
import jax.numpy as jnp
import numpy as np
from jax import lax
from jax.experimental import pallas as pl
from jax.experimental.pallas import tpu as pltpu


def _ceil_div(a, b):
    return -(-a // b)


def _round_up(x, m):
    return _ceil_div(x, m) * m


def _joints_mse_kernel(*refs, use_weight, spc, nb, rows_in_last, need_mask,
                       overrun):
    """Grid = (num_chunks, steps_per_chunk); one row-block per step.

    refs (use_weight=True):  w_ref (tile_r,1), pred_ref (tile_r,C),
                             gt_ref (tile_r,C), out_ref (1,1 SMEM),
                             acc_ref (1,C) VMEM scratch
    refs (use_weight=False): same without w_ref.
    """
    if use_weight:
        w_ref, pred_ref, gt_ref, out_ref, acc_ref = refs
    else:
        pred_ref, gt_ref, out_ref, acc_ref = refs

    c = pl.program_id(0)   # parallel chunk (one per TensorCore on v7x)
    s = pl.program_id(1)   # sequential step within the chunk
    blk = c * spc + s      # logical row-block index

    @pl.when(s == 0)
    def _():
        acc_ref[...] = jnp.zeros_like(acc_ref)

    def accumulate(mask_partial_rows):
        pred = pred_ref[...].astype(jnp.float32)
        gt = gt_ref[...].astype(jnp.float32)
        diff = pred - gt
        if use_weight:
            # (tile_r, 1) weight broadcasts over the spatial lanes.
            diff = diff * w_ref[...].astype(jnp.float32)
        sq = diff * diff
        if mask_partial_rows:
            # Only the last block can be partial; rows_in_last is static.
            row_ids = lax.broadcasted_iota(jnp.int32, sq.shape, 0)
            sq = jnp.where(row_ids < rows_in_last, sq, jnp.float32(0.0))
        # Lane-wise partial sums: cross-sublane reduce (XLU), tiny accumulator.
        acc_ref[...] += jnp.sum(sq, axis=0, keepdims=True)

    if need_mask:
        # Mask only on the (single) partial last block; everything else runs
        # the unmasked path.  Duplicated (clamped) blocks beyond nb are
        # skipped by both predicates.
        @pl.when(blk == nb - 1)
        def _():
            accumulate(True)

        @pl.when(blk < nb - 1)
        def _():
            accumulate(False)
    elif overrun:
        # Odd block count ceil-split: the trailing duplicated block (its
        # index_map is clamped to nb-1) must not be accumulated twice.
        @pl.when(blk < nb)
        def _():
            accumulate(False)
    else:
        accumulate(False)

    @pl.when(s == spc - 1)
    def _():
        out_ref[0, 0] = jnp.sum(acc_ref[...])


def joints_mse_loss(output, target, target_weight=None, use_target_weight=True,
                    block_bytes=4 << 20):
    """output, target: (B, J, H, W); target_weight: (B, J, 1).

    Returns a scalar float32 loss matching PyTorch's JointsMSELoss.forward.
    """
    B, J, H, W = output.shape
    HW = H * W
    R = B * J
    itemsize = jnp.dtype(output.dtype).itemsize
    w_itemsize = jnp.dtype(target_weight.dtype).itemsize if use_target_weight else 0

    # ---- choose a 2-D streaming view (free reshapes, no HBM copies) --------
    if (not use_target_weight) and (HW % 128 != 0):
        # Lane-dense flattening: avoid lane padding when the spatial size is
        # not a multiple of 128 (only possible on the unweighted path).
        N = R * HW
        for lane_w in (2048, 1024, 512, 256, 128):
            if N % lane_w == 0:
                R_eff, C_eff = N // lane_w, lane_w
                break
        else:
            R_eff, C_eff = R, HW
    else:
        R_eff, C_eff = R, HW

    pred = output.reshape(R_eff, C_eff)
    gt = target.reshape(R_eff, C_eff)

    # ---- dtype-aware row-tile sizing (~block_bytes per heatmap block) ------
    sub = max(8, 32 // itemsize)          # sublane multiple: f32 8, bf16 16, int8 32
    rows_from_bytes = max(sub, (block_bytes // (itemsize * C_eff)) // sub * sub)
    tile_r = R_eff if R_eff <= rows_from_bytes else rows_from_bytes

    C_pad = _round_up(C_eff, 128)

    def vmem_need(tr):
        tr_pad = _round_up(tr, sub)
        hm = 2 * 2 * tr_pad * C_pad * itemsize                 # 2 inputs, double-buffered
        wt = 2 * tr_pad * 128 * w_itemsize if use_target_weight else 0  # lane-padded weight
        acc = 8 * C_pad * 4                                    # (1, C) f32 accumulator
        return hm + wt + acc

    budget = 40 << 20        # headroom inside v7x's 64 MiB physical VMEM
    while tile_r > sub and vmem_need(tile_r) > budget:
        tile_r = max(sub, (tile_r // 2) // sub * sub)

    # ---- grid / 2-way TensorCore split --------------------------------------
    nb = _ceil_div(R_eff, tile_r)
    if nb >= 2:
        num_chunks = 2
        if nb % 2 == 1:
            # Try a slightly smaller tile that yields an even block count
            # (avoids the redundant duplicated-block DMA of the ceil-split).
            t2 = _round_up(_ceil_div(R_eff, nb + 1), sub)
            if 0 < t2 < R_eff and _ceil_div(R_eff, t2) % 2 == 0:
                tile_r = t2
                nb = _ceil_div(R_eff, t2)
        spc = _ceil_div(nb, num_chunks)
        overrun = num_chunks * spc > nb          # duplicated trailing block?
    else:
        num_chunks, spc, overrun = 1, 1, False

    need_mask = (R_eff % tile_r) != 0
    rows_in_last = R_eff - (nb - 1) * tile_r

    vmem_limit = int(min(max(vmem_need(tile_r) + (4 << 20), 16 << 20), 48 << 20))

    # ---- BlockSpecs ----------------------------------------------------------
    last_blk = nb - 1
    if overrun:
        def _blk_idx(c, s):
            return jnp.minimum(c * spc + s, last_blk)
    else:
        def _blk_idx(c, s):
            return c * spc + s

    hm_spec = pl.BlockSpec((tile_r, C_eff), lambda c, s: (_blk_idx(c, s), 0))
    in_specs = [hm_spec, hm_spec]
    args = (pred, gt)
    if use_target_weight:
        w = target_weight.reshape(R, 1)
        w_spec = pl.BlockSpec((tile_r, 1), lambda c, s: (_blk_idx(c, s), 0))
        in_specs = [w_spec] + in_specs
        args = (w,) + args

    kernel = functools.partial(
        _joints_mse_kernel,
        use_weight=use_target_weight,
        spc=spc,
        nb=nb,
        rows_in_last=rows_in_last,
        need_mask=need_mask,
        overrun=overrun,
    )

    n_elems = R_eff * C_eff
    cost = pl.CostEstimate(
        flops=(4 if use_target_weight else 3) * n_elems,
        transcendentals=0,
        bytes_accessed=2 * n_elems * itemsize
        + (R * w_itemsize if use_target_weight else 0)
        + num_chunks * 4,
    )

    partials = pl.pallas_call(
        kernel,
        out_shape=jax.ShapeDtypeStruct((num_chunks, 1), jnp.float32),
        grid_spec=pltpu.PrefetchScalarGridSpec(
            num_scalar_prefetch=0,
            grid=(num_chunks, spc),
            in_specs=in_specs,
            out_specs=pl.BlockSpec(
                (1, 1), lambda c, s: (c, 0), memory_space=pltpu.SMEM
            ),
            scratch_shapes=[pltpu.VMEM((1, C_eff), jnp.float32)],
        ),
        compiler_params=pltpu.CompilerParams(
            dimension_semantics=("parallel", "arbitrary"),
            vmem_limit_bytes=vmem_limit,
        ),
        cost_estimate=cost,
    )(*args)

    inv_denom = 0.5 / float(J * B * HW)
    return jnp.sum(partials) * jnp.float32(inv_denom)


def _reference_loss(output, target, target_weight, use_target_weight=True):
    """Pure-JAX reference mirroring the PyTorch per-joint loop."""
    B, J, H, W = output.shape
    pred = output.reshape(B, J, -1)
    gt = target.reshape(B, J, -1)
    loss = 0.0
    for idx in range(J):
        hp = pred[:, idx, :]
        hg = gt[:, idx, :]
        if use_target_weight:
            wj = target_weight[:, idx]          # (B, 1) broadcasts over HW
            loss += 0.5 * jnp.mean((hp * wj - hg * wj) ** 2)
        else:
            loss += 0.5 * jnp.mean((hp - hg) ** 2)
    return loss / J


if __name__ == "__main__":
    key = jax.random.PRNGKey(0)
    k1, k2, k3, k4 = jax.random.split(key, 4)

    # --- Case 1: basic shapes, weighted ------------------------------------
    B, J, H, W = 2, 4, 16, 16
    output = jax.random.normal(k1, (B, J, H, W), dtype=jnp.float32)
    target = jax.random.normal(k2, (B, J, H, W), dtype=jnp.float32)
    target_weight = jax.random.uniform(k3, (B, J, 1), dtype=jnp.float32)

    loss = jax.block_until_ready(
        joints_mse_loss(output, target, target_weight, use_target_weight=True))
    ref = _reference_loss(output, target, target_weight, use_target_weight=True)
    np.testing.assert_allclose(np.asarray(loss), np.asarray(ref), rtol=1e-5, atol=1e-6)

    # --- Case 2: unweighted fast path (HW already lane-aligned) -------------
    loss_nw = jax.block_until_ready(
        joints_mse_loss(output, target, None, use_target_weight=False))
    ref_nw = _reference_loss(output, target, target_weight, use_target_weight=False)
    np.testing.assert_allclose(np.asarray(loss_nw), np.asarray(ref_nw), rtol=1e-5, atol=1e-6)

    # --- Case 3: awkward shapes -> two blocks, partial last block (mask),
    #             even 2-chunk split ----------------------------------------
    B2, J2, H2, W2 = 3, 5, 8, 9
    out2 = jax.random.normal(k4, (B2, J2, H2, W2), dtype=jnp.float32)
    tgt2 = jax.random.normal(k1, (B2, J2, H2, W2), dtype=jnp.float32)
    w2 = jax.random.uniform(k2, (B2, J2, 1), dtype=jnp.float32)
    loss2 = jax.block_until_ready(
        joints_mse_loss(out2, tgt2, w2, use_target_weight=True, block_bytes=2048))
    ref2 = _reference_loss(out2, tgt2, w2, use_target_weight=True)
    np.testing.assert_allclose(np.asarray(loss2), np.asarray(ref2), rtol=1e-5, atol=1e-6)

    # --- Case 4: odd block count -> ceil-split with clamped duplicate block --
    B3, J3, H3, W3 = 4, 6, 8, 8
    out3 = jax.random.normal(k2, (B3, J3, H3, W3), dtype=jnp.float32)
    tgt3 = jax.random.normal(k3, (B3, J3, H3, W3), dtype=jnp.float32)
    w3 = jax.random.uniform(k4, (B3, J3, 1), dtype=jnp.float32)
    loss3 = jax.block_until_ready(
        joints_mse_loss(out3, tgt3, w3, use_target_weight=True, block_bytes=2048))
    ref3 = _reference_loss(out3, tgt3, w3, use_target_weight=True)
    np.testing.assert_allclose(np.asarray(loss3), np.asarray(ref3), rtol=1e-5, atol=1e-6)

    # --- Case 5: unweighted, HW % 128 != 0 -> lane-dense flattened view ------
    B4, J4, H4, W4 = 2, 4, 4, 8
    out4 = jax.random.normal(k3, (B4, J4, H4, W4), dtype=jnp.float32)
    tgt4 = jax.random.normal(k4, (B4, J4, H4, W4), dtype=jnp.float32)
    loss4 = jax.block_until_ready(
        joints_mse_loss(out4, tgt4, None, use_target_weight=False))
    ref4 = _reference_loss(out4, tgt4, None, use_target_weight=False)
    np.testing.assert_allclose(np.asarray(loss4), np.asarray(ref4), rtol=1e-5, atol=1e-6)

    print("KERNEL_OK")
</pallas_src>

<mosaic_0001>
module attributes {stable_mosaic.version = 11 : i64} {
  func.func @_joints_mse_kernel(%arg0: i32, %arg1: i32, %arg2: memref<8x1xf32, #tpu.memory_space<vmem>>, %arg3: memref<8x256xf32, #tpu.memory_space<vmem>>, %arg4: memref<8x256xf32, #tpu.memory_space<vmem>>, %arg5: memref<1x1xf32, #tpu.memory_space<smem>>, %arg6: memref<1x256xf32, #tpu.memory_space<vmem>>) attributes {dimension_semantics = [#tpu.dimension_semantics<parallel>, #tpu.dimension_semantics<arbitrary>], iteration_bounds = array<i64: 1, 1>, scalar_prefetch = 0 : i64, scratch_operands = 1 : i64, tpu.core_type = #tpu.core_type<tc>, window_params = [{transform_indices = @transform_0, window_bounds = array<i64: 8, 1>}, {transform_indices = @transform_1, window_bounds = array<i64: 8, 256>}, {transform_indices = @transform_2, window_bounds = array<i64: 8, 256>}, {transform_indices = @transform_3, window_bounds = array<i64: 1, 1>}]} {
    %c0_i32 = arith.constant 0 : i32
    %0 = arith.cmpi eq, %arg1, %c0_i32 : i32
    %1 = arith.extui %0 : i1 to i32
    %c0_i32_0 = arith.constant 0 : i32
    %2 = arith.cmpi ne, %1, %c0_i32_0 : i32
    scf.if %2 {
      %cst_12 = arith.constant 0.000000e+00 : f32
      %18 = vector.broadcast %cst_12 : f32 to vector<1x256xf32>
      %c0_13 = arith.constant 0 : index
      %c0_14 = arith.constant 0 : index
      %19 = vector.load %arg6[%c0_13, %c0_14] : memref<1x256xf32, #tpu.memory_space<vmem>>, vector<1x256xf32>
      tpu.vector_store %arg6[%c0_13, %c0_14], %18 {strides = array<i32>} : memref<1x256xf32, #tpu.memory_space<vmem>>, vector<1x256xf32>,
    } else {
    }
    %c0 = arith.constant 0 : index
    %c0_1 = arith.constant 0 : index
    %3 = vector.load %arg3[%c0, %c0_1] : memref<8x256xf32, #tpu.memory_space<vmem>>, vector<8x256xf32>
    %c0_2 = arith.constant 0 : index
    %c0_3 = arith.constant 0 : index
    %4 = vector.load %arg4[%c0_2, %c0_3] : memref<8x256xf32, #tpu.memory_space<vmem>>, vector<8x256xf32>
    %5 = arith.subf %3, %4 : vector<8x256xf32>
    %c0_4 = arith.constant 0 : index
    %c0_5 = arith.constant 0 : index
    %6 = vector.load %arg2[%c0_4, %c0_5] : memref<8x1xf32, #tpu.memory_space<vmem>>, vector<8x1xf32>
    %7 = vector.broadcast %6 : vector<8x1xf32> to vector<8x256xf32>
    %8 = arith.mulf %5, %7 : vector<8x256xf32>
    %9 = arith.mulf %8, %8 : vector<8x256xf32>
    %c0_6 = arith.constant 0 : index
    %c0_7 = arith.constant 0 : index
    %10 = vector.load %arg6[%c0_6, %c0_7] : memref<1x256xf32, #tpu.memory_space<vmem>>, vector<1x256xf32>
    %cst = arith.constant dense<0.000000e+00> : vector<256xf32>
    %11 = vector.multi_reduction <add>, %9, %cst [0] : vector<8x256xf32> to vector<256xf32>
    %12 = vector.shape_cast %11 : vector<256xf32> to vector<1x256xf32>
    %13 = arith.addf %10, %12 : vector<1x256xf32>
    %c0_8 = arith.constant 0 : index
    %c0_9 = arith.constant 0 : index
    %14 = vector.load %arg6[%c0_8, %c0_9] : memref<1x256xf32, #tpu.memory_space<vmem>>, vector<1x256xf32>
    tpu.vector_store %arg6[%c0_8, %c0_9], %13 {strides = array<i32>} : memref<1x256xf32, #tpu.memory_space<vmem>>, vector<1x256xf32>,
    %c0_i32_10 = arith.constant 0 : i32
    %15 = arith.cmpi eq, %arg1, %c0_i32_10 : i32
    %16 = arith.extui %15 : i1 to i32
    %c0_i32_11 = arith.constant 0 : i32
    %17 = arith.cmpi ne, %16, %c0_i32_11 : i32
    scf.if %17 {
      %c0_12 = arith.constant 0 : index
      %c0_13 = arith.constant 0 : index
      %18 = vector.load %arg6[%c0_12, %c0_13] : memref<1x256xf32, #tpu.memory_space<vmem>>, vector<1x256xf32>
      %19 = vector.shape_cast %18 : vector<1x256xf32> to vector<1x1x256xf32>
      %cst_14 = arith.constant dense<0.000000e+00> : vector<1xf32>
      %20 = vector.multi_reduction <add>, %19, %cst_14 [1, 2] : vector<1x1x256xf32> to vector<1xf32>
      %21 = vector.shape_cast %20 : vector<1xf32> to vector<1x1x1xf32>
      %22 = vector.extract %21[0, 0, 0] : f32 from vector<1x1x1xf32>
      %c0_15 = arith.constant 0 : index
      %c0_16 = arith.constant 0 : index
      %23 = memref.load %arg5[%c0_15, %c0_16] : memref<1x1xf32, #tpu.memory_space<smem>>
      memref.store %22, %arg5[%c0_15, %c0_16] : memref<1x1xf32, #tpu.memory_space<smem>>
    } else {
    }
    return
  }
  func.func @transform_0(%arg0: i32, %arg1: i32) -> (i32, i32) {
    %c1_i32 = arith.constant 1 : i32
    %0 = arith.muli %arg0, %c1_i32 : i32
    %1 = arith.addi %0, %arg1 : i32
    %c0_i32 = arith.constant 0 : i32
    %c0_i32_0 = arith.constant 0 : i32
    return %1, %c0_i32 : i32, i32
  }
  func.func @transform_1(%arg0: i32, %arg1: i32) -> (i32, i32) {
    %c1_i32 = arith.constant 1 : i32
    %0 = arith.muli %arg0, %c1_i32 : i32
    %1 = arith.addi %0, %arg1 : i32
    %c0_i32 = arith.constant 0 : i32
    %c0_i32_0 = arith.constant 0 : i32
    return %1, %c0_i32 : i32, i32
  }
  func.func @transform_2(%arg0: i32, %arg1: i32) -> (i32, i32) {
    %c1_i32 = arith.constant 1 : i32
    %0 = arith.muli %arg0, %c1_i32 : i32
    %1 = arith.addi %0, %arg1 : i32
    %c0_i32 = arith.constant 0 : i32
    %c0_i32_0 = arith.constant 0 : i32
    return %1, %c0_i32 : i32, i32
  }
  func.func @transform_3(%arg0: i32, %arg1: i32) -> (i32, i32) {
    %c0_i32 = arith.constant 0 : i32
    %c0_i32_0 = arith.constant 0 : i32
    return %arg0, %c0_i32 : i32, i32
  }
}

</mosaic_0001>

<bundles_post_ra>
// kernel: tpu_custom_call.1
= control target key start
LH: loop header
LB: loop body
LE: loop exit
PB: predicated region body
PF: predicated region fallthrough
CT: control target
= control target key end

     0   :  { %8 = vsyncpa [#allocation4], 0  ;;  %s297_s0 = inlined_call_operand.vmem [shape: f32[8,1], index: 0, kind: input, shape index: {}]   ;;  %s298_s1 = inlined_call_operand.hbm [shape: f32[8,256], index: 1, kind: input, shape index: {}]   ;;  %s299_s2 = inlined_call_operand.vmem [shape: f32[8,256], index: 2, kind: input, shape index: {}]   ;;  %s300_s3 = inlined_call_operand.hbm [shape: f32[1,1], index: 3, kind: output, shape index: {}]  }
   0x1   :  { %9 = vsyncpa [#allocation5], 0  ;;  %s231_s12 = smov [#allocation3]   ;;  %s195_s16 = scalar_lea.hbm %s298_s1, 256 }
   0x2   :  { %s28_s13 = sshll.u32 %s231_s12, 4  ;;  %p196_p0 = scmp.ne.s32.totalorder %s298_s1, %s195_s16  ;;  %s29_s13 = int_to_ptr.vmem [resolvable:$true] %s28_s13 }
   0x3   :  { %p199_p1 = scmp.lt.u32.totalorder %s195_s16, %s298_s1 }
   0x5   :  { %p201_p2 = pnand %p199_p1, %p196_p0 }
   0x7   :  { %204 = shalt.err (!%p201_p2)
}
   0x8   :  { %s205_s21 = scalar_lea.vmem %s29_s13, 256  ;;  %p210_p4 = scmp.lt.s32.totalorder %s29_s13, %s29_s13 }
   0x9   :  { %p206_p3 = scmp.ne.s32.totalorder %s29_s13, %s205_s21  ;;  %p211_p5 = scmp.lt.s32.totalorder %s205_s21, %s205_s21 }
   0xb   :  { %p212_p6 = por %p211_p5, %p210_p4 }
   0xd   :  { %p213_p7 = pnand %p212_p6, %p206_p3 }
   0xf   :  { %216 = shalt.err (!%p213_p7)
}
  0x10   :  { %31 = dma.hbm_to_vmem [thread:$0]  %s298_s1, 256, %s29_s13, [#allocation4]  }
  0x11   :  { %227 = dma.done.wait [#allocation4], 256  }
  0x12   :  { %228 = vsyncadd [#allocation4], 4294967040  ;;  %v232_v0 = vmov 0   ;;  %v84_v1 = vld [vmem:[%s297_s0] sm:$0xff]  ;;  %v73_v2 = vlaneseq  ;;  %v233_v4 = vmov 0.0   ;;  %v81_v8 = vld [vmem:[%s299_s2 + $0x8] sm:$0xff] }
  0x13   :  { %194 = vset.pattern.permute.xlu0 %v232_v0  ;;  %v78_v5 = vld [vmem:[#allocation3] sm:$0xff]  ;;  %v79_v6 = vld [vmem:[#allocation3 + $0x8] sm:$0xff]  ;;  %v234_v20 = vmov 1966171168   ;;  %vm146_vm1 = vcmask 1040384   ;;  %s217_s30 = scalar_lea.hbm %s300_s3, 16 }
  0x14   :  { %87 = vperm.xlu0 %194, %v84_v1   ;;  %vm271_vm0 = vcmp.lt.s32.totalorder %v73_v2, 256  ;;  %v80_v7 = vld [vmem:[%s299_s2] sm:$0xff]  ;;  %v83_v10 = vsub.f32 %v79_v6, %v81_v8  ;;  %v111_v21 = vunpack.c.l.s4 %v234_v20  ;;  %v114_v27 = vshrl.u32 %v73_v2, 7  ;;  %p218_p8 = scmp.ne.s32.totalorder %s300_s3, %s217_s30  ;;  %p221_p9 = scmp.lt.u32.totalorder %s217_s30, %s300_s3 }
  0x15   :  { %77 = vst.msk [vmem:[#allocation2] sm:$0x3] %vm271_vm0, %v233_v4  ;;  %v82_v9 = vsub.f32 %v78_v5, %v80_v7 }
  0x16   :  { %v112_v26 = vunpack.c.0.s8 %v111_v21  ;;  %v138_v38 = vsub.s32 0, %v114_v27  ;;  %v142_v39 = vsub.s32 1, %v114_v27  ;;  %p223_p10 = pnand %p221_p9, %p218_p8 }
  0x18   :  { %v115_v32 = vsub.s32 %v112_v26, %v114_v27 }
  0x1c   :  { %v94_v35 = vld [vmem:[#allocation2] sm:$0x3] }
  0x93   :  { %v88_v11 = vpop.permute.xlu0 %87 }
  0x94   :  { %v90_v12 = vmul.f32 %v88_v11, %v82_v9  ;;  %v91_v13 = vmul.f32 %v88_v11, %v83_v10 }
  0x96   :  { %v92_v14 = vmul.f32 %v90_v12, %v90_v12  ;;  %v93_v15 = vmul.f32 %v91_v13, %v91_v13 }
  0x98   :  { %v95_v16 = vrot.slane %v92_v14, 4  ;;  %v101_v17 = vrot.slane %v93_v15, 4 }
  0x9a   :  { %v96_v18 = vadd.f32 %v95_v16, %v92_v14  ;;  %v102_v19 = vadd.f32 %v101_v17, %v93_v15 }
  0x9c   :  { %v97_v22 = vrot.slane %v96_v18, 2  ;;  %v103_v23 = vrot.slane %v102_v19, 2 }
  0x9e   :  { %v98_v24 = vadd.f32 %v97_v22, %v96_v18  ;;  %v104_v25 = vadd.f32 %v103_v23, %v102_v19 }
  0xa0   :  { %v99_v28 = vrot.slane %v98_v24, 1  ;;  %v105_v29 = vrot.slane %v104_v25, 1 }
  0xa2   :  { %v100_v30 = vadd.f32 %v99_v28, %v98_v24  ;;  %v106_v31 = vadd.f32 %v105_v29, %v104_v25 }
  0xa4   :  { %v109_v33 = vcombine.low %v100_v30, %v106_v31 }
  0xa6   :  { %v116_v34 = vrot.slane %v109_v33, %v115_v32 }
  0xa8   :  { %v123_v36 = vrot.slane %v116_v34, %v115_v32 }
  0xaa   :  { %v125_v37 = vadd.f32 %v123_v36, %v94_v35 }
  0xac   :  { %130 = vst.msk [vmem:[#allocation2] sm:$0x3] %vm271_vm0, %v125_v37 }
  0xb3   :  { %v134_v40 = vld [vmem:[#allocation2] sm:$0x3] }
  0xb4   :  { %v139_v41 = vrot.slane %v134_v40, %v138_v38  ;;  %v143_v42 = vrot.slane %v134_v40, %v142_v39 }
  0xb6   :  { %v147_v43 = vsel %vm146_vm1, %v139_v41, 0.0  ;;  %v148_v44 = vsel %vm146_vm1, %v143_v42, 0.0 }
  0xb7   :  { %v149_v45 = vadd.f32 %v148_v44, %v147_v43 }
  0xb9   :  { %150 = vadd.xlane.f32.xlu0 %v149_v45 }
 0x146   :  { %v151_v46 = vpop.xlane.xlu0 %150 }
 0x147   :  { %v152_v47 = vrot.slane %v151_v46, 4 }
 0x149   :  { %v153_v48 = vadd.f32 %v152_v47, %v151_v46 }
 0x14b   :  { %v154_v49 = vrot.slane %v153_v48, 2 }
 0x14d   :  { %v155_v50 = vadd.f32 %v154_v49, %v153_v48 }
 0x14f   :  { %v156_v51 = vrot.slane %v155_v50, 1 }
 0x151   :  { %v157_v52 = vadd.f32 %v156_v51, %v155_v50 }
 0x153   :  { %187 = vpush %v157_v52 }
 0x184   :  { %s188_s0 = spop %187 }
 0x185   :  { %160 = sst [smem:[#allocation6]] %s188_s0 }
 0x186   :  { %226 = shalt.err (!%p223_p10)
}
 0x187   :  { %s235_s8 = smov [#allocation6]  }
 0x188   :  { %168 = dma.smem_to_hbm %s235_s8, 16, %s300_s3, [#allocation5]  }
 0x189   :  { %229 = dma.done.wait [#allocation5], 16  }
 0x18a   :  { %230 = vsyncadd [#allocation5], 4294967280 }
 0x18b   :  { %172 = sfence }
 0x18c   :  { %173 = vsyncpa [#allocation4], 1 }
 0x18d   :  { %174 = vsyncpa [#allocation5], 1 }

</bundles_post_ra>
